<compile_context>
chip_gen: v6e
topology: v6e:2x2x1
jax: 0.10.0
libtpu: 0.0.40
codegen_flags: <defaults>
</compile_context>

<pallas_src>
import jax
import jax.numpy as jnp
from jax import lax
from jax.experimental import pallas as pl
from jax.experimental.pallas import tpu as pltpu


def _pos_encoding_kernel(lens_scaled_ref, pe_ref, out_ref):
    """One grid step: all batch rows for one lane-dense tile of the folded (L*D) axis.

    lens_scaled_ref : VMEM int32 [B, 1]   -- per-sequence length * d_model
    pe_ref          : VMEM f32   [1, tC]  -- positional-encoding values for these columns
    out_ref         : VMEM       [B, tC]  -- output tile (lane-dense)
    """
    tC = out_ref.shape[1]
    # Global folded-column index for each lane of this tile (no HBM position stream).
    col = pl.program_id(0) * tC + lax.broadcasted_iota(jnp.int32, (1, tC), 1)   # (1, tC)
    mask = col < lens_scaled_ref[...]                                           # (B, tC)
    out_ref[...] = jnp.where(mask, pe_ref[...], 0.0).astype(out_ref.dtype)


def build_position_encoding_table(d_model: int, max_seq_len: int) -> jax.Array:
    """Reproduces the table built in PositionalEncoding.__init__ (row 0 = zero pad)."""
    pos = jnp.arange(max_seq_len, dtype=jnp.float32)[:, None]           # [S, 1]
    j = jnp.arange(d_model)                                             # [D]
    angle = pos / jnp.power(
        jnp.float32(10000.0), 2.0 * (j // 2).astype(jnp.float32) / d_model
    )                                                                   # [S, D]
    pe = jnp.where((j % 2) == 0, jnp.sin(angle), jnp.cos(angle))        # [S, D]
    pad_row = jnp.zeros((1, d_model), dtype=jnp.float32)
    return jnp.concatenate([pad_row, pe], axis=0).astype(jnp.float32)   # [S+1, D]


def _vmem_budget_bytes() -> int:
    """Generation-aware tile budget: half of physical VMEM, capped (v7x only has 64 MiB/TC)."""
    try:
        phys = int(pltpu.get_tpu_info().vmem_capacity_bytes)
    except Exception:  # conservative fallback if the query is unavailable
        phys = 64 * 1024 * 1024
    return int(min(phys // 2, 48 * 1024 * 1024))


def _choose_tile(total: int, per_col_bytes: int, budget_bytes: int) -> int:
    """Pick a 128-aligned tile along the folded L*D axis.

    Prefers ~4 blocks so both v7x TensorCores get work under "parallel" semantics,
    but never exceeds the VMEM budget and never goes below 128 columns.
    """
    max_cols = max(128, (budget_bytes // per_col_bytes // 128) * 128)
    if total < 256:
        # Too small to split into two 128-aligned tiles; one full-extent block is legal
        # (block dim equal to the full array dim bypasses the 128-divisibility rule).
        return total
    quarter = (total + 3) // 4
    desired = ((quarter + 127) // 128) * 128
    return int(max(128, min(max_cols, desired)))


def positional_encoding_forward(
    input_len: jax.Array,
    table: jax.Array,
    max_len: int,
    out_dtype=jnp.float32,
) -> jax.Array:
    """Forward pass: returns [B, max_len, d_model] positional encodings, pad-aligned.

    `max_len` is a static Python int (== max(input_len) in the PyTorch module, or simply
    max_seq_len); keeping it static avoids a device->host sync and keeps this jittable.
    """
    lens = jnp.asarray(input_len).reshape(-1, 1).astype(jnp.int32)       # [B, 1]
    B = lens.shape[0]
    _, D = table.shape
    total = max_len * D

    # Rows 1..max_len of the table, folded lane-dense (host/XLA-side glue, tiny).
    pe_flat = table[1 : max_len + 1].reshape(1, total).astype(jnp.float32)   # [1, L*D]
    # Precompute len*D so the in-kernel mask is a single compare vs a folded-column iota.
    lens_scaled = lens * jnp.int32(D)                                        # [B, 1]

    out_bytes = jnp.dtype(out_dtype).itemsize
    per_col = 2 * (B * out_bytes + 4)          # double-buffered out tile + pe tile, per column
    tC = _choose_tile(total, per_col, _vmem_budget_bytes())
    grid = (pl.cdiv(total, tC),)
    vmem_limit = tC * per_col + 4 * 1024 * 1024   # tiles + headroom (lens, sems, scratch)

    out_flat = pl.pallas_call(
        _pos_encoding_kernel,
        out_shape=jax.ShapeDtypeStruct((B, total), out_dtype),
        grid_spec=pltpu.PrefetchScalarGridSpec(
            num_scalar_prefetch=0,
            grid=grid,
            in_specs=[
                pl.BlockSpec((B, 1), lambda i: (0, 0)),    # lens*D (tiny, grid-invariant)
                pl.BlockSpec((1, tC), lambda i: (0, i)),   # PE values tile (lane-dense)
            ],
            out_specs=pl.BlockSpec((B, tC), lambda i: (0, i)),
        ),
        compiler_params=pltpu.CompilerParams(
            dimension_semantics=("parallel",),
            vmem_limit_bytes=int(vmem_limit),
        ),
    )(lens_scaled, pe_flat)

    return out_flat.reshape(B, max_len, D)


if __name__ == "__main__":
    d_model = 32
    max_seq_len = 8
    batch = 2

    key = jax.random.PRNGKey(0)
    # input_len: [BATCH_SIZE, 1], each entry in [1, max_seq_len]
    input_len = jax.random.randint(key, (batch, 1), 1, max_seq_len + 1).astype(jnp.int32)

    table = build_position_encoding_table(d_model, max_seq_len)

    # Static max_len chosen by the caller (mirrors torch.max(input_len) outside the kernel;
    # the single int() here is caller-side, the traced wrapper has no host sync).
    max_len = int(input_len.max())

    fwd = jax.jit(positional_encoding_forward, static_argnums=(2,))
    out = fwd(input_len, table, max_len)
    out = jax.block_until_ready(out)

    # Pure-JAX reference (same semantics as the PyTorch forward).
    lens = input_len.reshape(-1)
    pos_range = jnp.arange(1, max_len + 1)[None, :]                      # [1, L]
    input_pos = jnp.where(pos_range <= lens[:, None], pos_range, 0)      # [B, L]
    ref = jnp.take(table, input_pos, axis=0)                             # [B, L, D]

    assert out.shape == (batch, max_len, d_model), out.shape
    assert jnp.allclose(out, ref, atol=1e-5), "mismatch vs reference"

    print("KERNEL_OK")
</pallas_src>

<mosaic_0001>
module attributes {stable_mosaic.version = 11 : i64} {
  func.func @_pos_encoding_kernel(%arg0: i32, %arg1: memref<2x1xi32, #tpu.memory_space<vmem>>, %arg2: memref<1x192xf32, #tpu.memory_space<vmem>>, %arg3: memref<2x192xf32, #tpu.memory_space<vmem>>) attributes {dimension_semantics = [#tpu.dimension_semantics<parallel>], iteration_bounds = array<i64: 1>, scalar_prefetch = 0 : i64, scratch_operands = 0 : i64, tpu.core_type = #tpu.core_type<tc>, window_params = [{pipeline_mode = #tpu.pipeline_mode<synchronous>, transform_indices = @transform_0, window_bounds = array<i64: 2, 1>}, {transform_indices = @transform_1, window_bounds = array<i64: 1, 192>}, {transform_indices = @transform_2, window_bounds = array<i64: 2, 192>}]} {
    %c192_i32 = arith.constant 192 : i32
    %0 = arith.muli %arg0, %c192_i32 : i32
    %1 = tpu.iota {dimensions = array<i32: 1>} : vector<1x192xi32>
    %2 = vector.broadcast %0 : i32 to vector<1x192xi32>
    %3 = arith.addi %2, %1 : vector<1x192xi32>
    %c0 = arith.constant 0 : index
    %c0_0 = arith.constant 0 : index
    %4 = vector.load %arg1[%c0, %c0_0] : memref<2x1xi32, #tpu.memory_space<vmem>>, vector<2x1xi32>
    %5 = vector.broadcast %3 : vector<1x192xi32> to vector<2x192xi32>
    %6 = vector.broadcast %4 : vector<2x1xi32> to vector<2x192xi32>
    %7 = arith.cmpi slt, %5, %6 : vector<2x192xi32>
    %c0_1 = arith.constant 0 : index
    %c0_2 = arith.constant 0 : index
    %8 = vector.load %arg2[%c0_1, %c0_2] : memref<1x192xf32, #tpu.memory_space<vmem>>, vector<1x192xf32>
    %cst = arith.constant 0.000000e+00 : f32
    %9 = vector.shape_cast %8 : vector<1x192xf32> to vector<1x192xf32>
    %10 = vector.broadcast %9 : vector<1x192xf32> to vector<2x192xf32>
    %11 = vector.broadcast %cst : f32 to vector<2x192xf32>
    %12 = arith.select %7, %10, %11 : vector<2x192xi1>, vector<2x192xf32>
    %c0_3 = arith.constant 0 : index
    %c0_4 = arith.constant 0 : index
    %13 = vector.load %arg3[%c0_3, %c0_4] : memref<2x192xf32, #tpu.memory_space<vmem>>, vector<2x192xf32>
    tpu.vector_store %arg3[%c0_3, %c0_4], %12 {strides = array<i32>} : memref<2x192xf32, #tpu.memory_space<vmem>>, vector<2x192xf32>,
    return
  }
  func.func @transform_0(%arg0: i32) -> (i32, i32) {
    %c0_i32 = arith.constant 0 : i32
    %c0_i32_0 = arith.constant 0 : i32
    %c0_i32_1 = arith.constant 0 : i32
    return %c0_i32, %c0_i32_0 : i32, i32
  }
  func.func @transform_1(%arg0: i32) -> (i32, i32) {
    %c0_i32 = arith.constant 0 : i32
    %c0_i32_0 = arith.constant 0 : i32
    return %c0_i32, %arg0 : i32, i32
  }
  func.func @transform_2(%arg0: i32) -> (i32, i32) {
    %c0_i32 = arith.constant 0 : i32
    %c0_i32_0 = arith.constant 0 : i32
    return %c0_i32, %arg0 : i32, i32
  }
}

</mosaic_0001>

<bundles_post_ra>
// kernel: positional_encoding_forward.1
= control target key start
LH: loop header
LB: loop body
LE: loop exit
PB: predicated region body
PF: predicated region fallthrough
CT: control target
= control target key end

     0   :  { %v60_v0 = vmov 0   ;;  %v12_v2 = vlaneseq  ;;  %v61_v5 = vmov 1983009808   ;;  %vm49_vm0 = vcmask 1041408   ;;  %s86_s0 = inlined_call_operand.vmem [shape: s32[2,1], index: 0, kind: input, shape index: {}]   ;;  %s87_s1 = inlined_call_operand.vmem [shape: f32[1,192], index: 1, kind: input, shape index: {}]   ;;  %s88_s2 = inlined_call_operand.vmem [shape: f32[2,192], index: 2, kind: output, shape index: {}]  }
   0x1   :  { %59 = vset.pattern.permute.xlu0 %v60_v0  ;;  %v18_v1 = vld [vmem:[%s86_s0] sm:$0x3]  ;;  %v42_v6 = vunpack.c.l.s4 %v61_v5  ;;  %vm50_vm1 = vcmask 519170  }
   0x2   :  { %20 = vperm.xlu0 %59, %v18_v1   ;;  %v27_v3 = vshrl.u32 %v12_v2, 7  ;;  %v13_v4 = vand.u32 127, %v12_v2  ;;  %v24_v9 = vld [vmem:[%s87_s1] sm:$0x3]  ;;  %vm51_vm4 = vmor %vm50_vm1, %vm49_vm0 }
   0x3   :  { %v43_v11 = vunpack.c.0.s8 %v42_v6 }
   0x4   :  { %v28_v7 = vsub.s32 0, %v27_v3  ;;  %v32_v8 = vsub.s32 1, %v27_v3  ;;  %v14_v10 = vadd.s32 128, %v13_v4 }
   0x5   :  { %v46_v15 = vsub.s32 %v43_v11, %v27_v3 }
   0x6   :  { %v29_v12 = vrot.slane %v24_v9, %v28_v7  ;;  %v33_v13 = vrot.slane %v24_v9, %v32_v8 }
  0x7d   :  { %v21_v14 = vpop.permute.xlu0 %20 }
  0x7e   :  { %vm22_vm2 = vcmp.lt.s32.totalorder %v13_v4, %v21_v14  ;;  %vm23_vm3 = vcmp.lt.s32.totalorder %v14_v10, %v21_v14 }
  0x7f   :  { %v36_v16 = vsel %vm22_vm2, %v29_v12, 0.0  ;;  %v37_v17 = vsel %vm23_vm3, %v33_v13, 0.0 }
  0x80   :  { %v40_v18 = vcombine.low %v36_v16, %v37_v17 }
  0x82   :  { %v47_v19 = vrot.slane %v40_v18, %v46_v15 }
  0x84   :  { %52 = vst.msk [vmem:[%s88_s2] sm:$0xf] %vm51_vm4, %v47_v19 }

</bundles_post_ra>
